<compile_context>
chip_gen: v5e
topology: v5e:2x2
jax: 0.10.0
libtpu: 0.0.40
codegen_flags: <defaults>
</compile_context>

<pallas_src>
import jax
import jax.numpy as jnp
from jax.experimental import pallas as pl
from jax.experimental.pallas import tpu as pltpu


_LANES = 512      # lane width of one plane row (multiple of 128)
_ROWS_MAX = 512   # max sublane rows per plane tile (multiple of 8)
_NC_MAX = 2       # leading "parallel" grid axis (v7x has 2 TensorCores)


def _round_up(x, m):
    return ((x + m - 1) // m) * m


def _mah_loss_kernel(d_ref, s_ref, out_ref, acc_ref):
    """One grid step: accumulate sum_k sub_k^T Sigma_inv_k sub_k over a tile.

    d_ref:   (2, rows, LANES) block, planes [sub_x, sub_y]
    s_ref:   (4, rows, LANES) block, planes [s00, s01, s10, s11]
    out_ref: (1, 8, 128) per-core partial-sum block (scalar broadcast)
    acc_ref: (rows, LANES) f32 VMEM accumulator (per core)
    """
    t = pl.program_id(1)

    @pl.when(t == 0)
    def _init():
        acc_ref[...] = jnp.zeros_like(acc_ref)

    # Dense per-plane (rows, LANES) views; f32 upcast in-kernel (free VPU slack).
    sx = d_ref[0].astype(jnp.float32)
    sy = d_ref[1].astype(jnp.float32)
    s00 = s_ref[0].astype(jnp.float32)
    s01 = s_ref[1].astype(jnp.float32)
    s10 = s_ref[2].astype(jnp.float32)
    s11 = s_ref[3].astype(jnp.float32)

    # sub^T Sigma_inv sub, reassociated; 0.5 and the mean are applied once in
    # the wrapper.  Zero-padded landmarks contribute exactly 0.
    acc_ref[...] += sx * (sx * s00 + sy * (s01 + s10)) + sy * sy * s11

    @pl.when(t == pl.num_programs(1) - 1)
    def _finalize():
        out_ref[...] = jnp.full(out_ref.shape, jnp.sum(acc_ref[...]),
                                dtype=jnp.float32)


@jax.jit
def mah_loss(pred_landmarks, ground_truth, sigma_inverse):
    """pred_landmarks, ground_truth: (B, N, 2); sigma_inverse: (B, N, 2, 2)."""
    B, N, _ = pred_landmarks.shape
    M = B * N
    dt = jnp.result_type(pred_landmarks.dtype, ground_truth.dtype,
                         sigma_inverse.dtype)

    # ---- tiling -------------------------------------------------------------
    rows_needed = -(-M // _LANES)                         # ceil(M / LANES)
    nc = _NC_MAX if rows_needed >= 2 * 8 else 1           # >= one (8,LANES) tile/core
    steps_per_core = -(-rows_needed // (nc * _ROWS_MAX))
    rows = _round_up(-(-rows_needed // (nc * steps_per_core)), 8)
    Rp = nc * steps_per_core * rows                        # padded rows of LANES
    Mp = Rp * _LANES                                       # padded landmark count

    # ---- relayout: two plane-major, zero-padded slabs -----------------------
    # (the subtraction fuses into the transpose pass; zero rows sum to 0)
    sub = (ground_truth.astype(dt) - pred_landmarks.astype(dt)).reshape(M, 2)
    sig = sigma_inverse.astype(dt).reshape(M, 4)
    if Mp != M:
        sub = jnp.pad(sub, ((0, Mp - M), (0, 0)))
        sig = jnp.pad(sig, ((0, Mp - M), (0, 0)))
    d_planes = sub.T.reshape(2, Rp, _LANES)
    s_planes = sig.T.reshape(4, Rp, _LANES)

    spc = steps_per_core
    partials = pl.pallas_call(
        _mah_loss_kernel,
        out_shape=jax.ShapeDtypeStruct((nc, 8, 128), jnp.float32),
        grid_spec=pltpu.PrefetchScalarGridSpec(
            num_scalar_prefetch=0,
            grid=(nc, steps_per_core),
            in_specs=[
                pl.BlockSpec((2, rows, _LANES),
                             lambda c, t: (0, c * spc + t, 0)),
                pl.BlockSpec((4, rows, _LANES),
                             lambda c, t: (0, c * spc + t, 0)),
            ],
            out_specs=pl.BlockSpec((1, 8, 128), lambda c, t: (c, 0, 0)),
            scratch_shapes=[pltpu.VMEM((rows, _LANES), jnp.float32)],
        ),
        compiler_params=pltpu.CompilerParams(
            dimension_semantics=("parallel", "arbitrary"),
            vmem_limit_bytes=32 * 1024 * 1024,
        ),
    )(d_planes, s_planes)

    total = jnp.sum(partials[:, 0, 0])
    return 0.5 * total / jnp.float32(M)


def _mah_loss_reference(pred, gt, sigma):
    """Pure-JAX reference mirroring the PyTorch module."""
    sub = gt - pred                                              # (B, N, 2)
    prod = jnp.einsum("bni,bnij,bnj->bn", sub, sigma, sub)       # (B, N)
    return jnp.mean(jnp.mean(0.5 * prod, axis=1))


def _make_inputs(key, B, N, dtype=jnp.float32):
    k1, k2, k3 = jax.random.split(key, 3)
    pred = jax.random.normal(k1, (B, N, 2), dtype=dtype)
    gt = jax.random.normal(k2, (B, N, 2), dtype=dtype)
    # Positive-definite Sigma_inverse per (b, n): A A^T + I
    A = jax.random.normal(k3, (B, N, 2, 2), dtype=dtype)
    sigma = jnp.einsum("bnij,bnkj->bnik", A, A) + jnp.eye(2, dtype=dtype)
    return pred, gt, sigma


if __name__ == "__main__":
    key = jax.random.PRNGKey(0)

    # Small shape from the module spec (single grid step, single core).
    pred, gt, sigma = _make_inputs(key, B=2, N=8)
    loss = mah_loss(pred, gt, sigma)
    jax.block_until_ready(loss)
    ref = _mah_loss_reference(pred, gt, sigma)
    assert jnp.allclose(loss, ref, rtol=1e-5, atol=1e-5), (loss, ref)

    # Medium shape: exercises the 2-way "parallel" core-split axis + padding.
    pred, gt, sigma = _make_inputs(jax.random.fold_in(key, 1), B=4, N=20000)
    loss = mah_loss(pred, gt, sigma)
    ref = _mah_loss_reference(pred, gt, sigma)
    assert jnp.allclose(loss, ref, rtol=1e-4, atol=1e-5), (loss, ref)

    # Larger, odd-sized: exercises multi-step accumulation + ragged zero pad.
    pred, gt, sigma = _make_inputs(jax.random.fold_in(key, 2), B=8, N=70001)
    loss = mah_loss(pred, gt, sigma)
    jax.block_until_ready(loss)
    ref = _mah_loss_reference(pred, gt, sigma)
    assert jnp.allclose(loss, ref, rtol=1e-4, atol=1e-5), (loss, ref)

    print("KERNEL_OK")
</pallas_src>

<mosaic_0001>
module attributes {stable_mosaic.version = 11 : i64} {
  func.func @_mah_loss_kernel(%arg0: i32, %arg1: i32, %arg2: memref<2x8x512xf32, #tpu.memory_space<vmem>>, %arg3: memref<4x8x512xf32, #tpu.memory_space<vmem>>, %arg4: memref<1x8x128xf32, #tpu.memory_space<vmem>>, %arg5: memref<8x512xf32, #tpu.memory_space<vmem>>) attributes {dimension_semantics = [#tpu.dimension_semantics<parallel>, #tpu.dimension_semantics<arbitrary>], iteration_bounds = array<i64: 1, 1>, scalar_prefetch = 0 : i64, scratch_operands = 1 : i64, tpu.core_type = #tpu.core_type<tc>, window_params = [{transform_indices = @transform_0, window_bounds = array<i64: 2, 8, 512>}, {transform_indices = @transform_1, window_bounds = array<i64: 4, 8, 512>}, {transform_indices = @transform_2, window_bounds = array<i64: 1, 8, 128>}]} {
    %c0_i32 = arith.constant 0 : i32
    %0 = arith.cmpi eq, %arg1, %c0_i32 : i32
    %1 = arith.extui %0 : i1 to i32
    %c0_i32_0 = arith.constant 0 : i32
    %2 = arith.cmpi ne, %1, %c0_i32_0 : i32
    scf.if %2 {
      %cst = arith.constant 0.000000e+00 : f32
      %29 = vector.broadcast %cst : f32 to vector<8x512xf32>
      %c0_21 = arith.constant 0 : index
      %c0_22 = arith.constant 0 : index
      %30 = vector.load %arg5[%c0_21, %c0_22] : memref<8x512xf32, #tpu.memory_space<vmem>>, vector<8x512xf32>
      tpu.vector_store %arg5[%c0_21, %c0_22], %29 {strides = array<i32>} : memref<8x512xf32, #tpu.memory_space<vmem>>, vector<8x512xf32>,
    } else {
    }
    %c0 = arith.constant 0 : index
    %c0_1 = arith.constant 0 : index
    %c0_2 = arith.constant 0 : index
    %3 = vector.load %arg2[%c0, %c0_1, %c0_2] : memref<2x8x512xf32, #tpu.memory_space<vmem>>, vector<1x8x512xf32>
    %4 = vector.shape_cast %3 : vector<1x8x512xf32> to vector<8x512xf32>
    %c1 = arith.constant 1 : index
    %c0_3 = arith.constant 0 : index
    %c0_4 = arith.constant 0 : index
    %5 = vector.load %arg2[%c1, %c0_3, %c0_4] : memref<2x8x512xf32, #tpu.memory_space<vmem>>, vector<1x8x512xf32>
    %6 = vector.shape_cast %5 : vector<1x8x512xf32> to vector<8x512xf32>
    %c0_5 = arith.constant 0 : index
    %c0_6 = arith.constant 0 : index
    %c0_7 = arith.constant 0 : index
    %7 = vector.load %arg3[%c0_5, %c0_6, %c0_7] : memref<4x8x512xf32, #tpu.memory_space<vmem>>, vector<1x8x512xf32>
    %8 = vector.shape_cast %7 : vector<1x8x512xf32> to vector<8x512xf32>
    %c1_8 = arith.constant 1 : index
    %c0_9 = arith.constant 0 : index
    %c0_10 = arith.constant 0 : index
    %9 = vector.load %arg3[%c1_8, %c0_9, %c0_10] : memref<4x8x512xf32, #tpu.memory_space<vmem>>, vector<1x8x512xf32>
    %10 = vector.shape_cast %9 : vector<1x8x512xf32> to vector<8x512xf32>
    %c2 = arith.constant 2 : index
    %c0_11 = arith.constant 0 : index
    %c0_12 = arith.constant 0 : index
    %11 = vector.load %arg3[%c2, %c0_11, %c0_12] : memref<4x8x512xf32, #tpu.memory_space<vmem>>, vector<1x8x512xf32>
    %12 = vector.shape_cast %11 : vector<1x8x512xf32> to vector<8x512xf32>
    %c3 = arith.constant 3 : index
    %c0_13 = arith.constant 0 : index
    %c0_14 = arith.constant 0 : index
    %13 = vector.load %arg3[%c3, %c0_13, %c0_14] : memref<4x8x512xf32, #tpu.memory_space<vmem>>, vector<1x8x512xf32>
    %14 = vector.shape_cast %13 : vector<1x8x512xf32> to vector<8x512xf32>
    %c0_15 = arith.constant 0 : index
    %c0_16 = arith.constant 0 : index
    %15 = vector.load %arg5[%c0_15, %c0_16] : memref<8x512xf32, #tpu.memory_space<vmem>>, vector<8x512xf32>
    %16 = arith.mulf %4, %8 : vector<8x512xf32>
    %17 = arith.addf %10, %12 : vector<8x512xf32>
    %18 = arith.mulf %6, %17 : vector<8x512xf32>
    %19 = arith.addf %16, %18 : vector<8x512xf32>
    %20 = arith.mulf %4, %19 : vector<8x512xf32>
    %21 = arith.mulf %6, %6 : vector<8x512xf32>
    %22 = arith.mulf %21, %14 : vector<8x512xf32>
    %23 = arith.addf %20, %22 : vector<8x512xf32>
    %24 = arith.addf %15, %23 : vector<8x512xf32>
    %c0_17 = arith.constant 0 : index
    %c0_18 = arith.constant 0 : index
    %25 = vector.load %arg5[%c0_17, %c0_18] : memref<8x512xf32, #tpu.memory_space<vmem>>, vector<8x512xf32>
    tpu.vector_store %arg5[%c0_17, %c0_18], %24 {strides = array<i32>} : memref<8x512xf32, #tpu.memory_space<vmem>>, vector<8x512xf32>,
    %c0_i32_19 = arith.constant 0 : i32
    %26 = arith.cmpi eq, %arg1, %c0_i32_19 : i32
    %27 = arith.extui %26 : i1 to i32
    %c0_i32_20 = arith.constant 0 : i32
    %28 = arith.cmpi ne, %27, %c0_i32_20 : i32
    scf.if %28 {
      %c0_21 = arith.constant 0 : index
      %c0_22 = arith.constant 0 : index
      %29 = vector.load %arg5[%c0_21, %c0_22] : memref<8x512xf32, #tpu.memory_space<vmem>>, vector<8x512xf32>
      %30 = vector.shape_cast %29 : vector<8x512xf32> to vector<1x8x512xf32>
      %cst = arith.constant dense<0.000000e+00> : vector<1xf32>
      %31 = vector.multi_reduction <add>, %30, %cst [1, 2] : vector<1x8x512xf32> to vector<1xf32>
      %32 = vector.shape_cast %31 : vector<1xf32> to vector<1x1x1xf32>
      %33 = vector.extract %32[0, 0, 0] : f32 from vector<1x1x1xf32>
      %34 = vector.broadcast %33 : f32 to vector<1x8x128xf32>
      %c0_23 = arith.constant 0 : index
      %c0_24 = arith.constant 0 : index
      %c0_25 = arith.constant 0 : index
      %35 = vector.load %arg4[%c0_23, %c0_24, %c0_25] : memref<1x8x128xf32, #tpu.memory_space<vmem>>, vector<1x8x128xf32>
      tpu.vector_store %arg4[%c0_23, %c0_24, %c0_25], %34 {strides = array<i32>} : memref<1x8x128xf32, #tpu.memory_space<vmem>>, vector<1x8x128xf32>,
    } else {
    }
    return
  }
  func.func @transform_0(%arg0: i32, %arg1: i32) -> (i32, i32, i32) {
    %c1_i32 = arith.constant 1 : i32
    %0 = arith.muli %arg0, %c1_i32 : i32
    %1 = arith.addi %0, %arg1 : i32
    %c0_i32 = arith.constant 0 : i32
    %c0_i32_0 = arith.constant 0 : i32
    %c0_i32_1 = arith.constant 0 : i32
    return %c0_i32, %1, %c0_i32_0 : i32, i32, i32
  }
  func.func @transform_1(%arg0: i32, %arg1: i32) -> (i32, i32, i32) {
    %c1_i32 = arith.constant 1 : i32
    %0 = arith.muli %arg0, %c1_i32 : i32
    %1 = arith.addi %0, %arg1 : i32
    %c0_i32 = arith.constant 0 : i32
    %c0_i32_0 = arith.constant 0 : i32
    %c0_i32_1 = arith.constant 0 : i32
    return %c0_i32, %1, %c0_i32_0 : i32, i32, i32
  }
  func.func @transform_2(%arg0: i32, %arg1: i32) -> (i32, i32, i32) {
    %c0_i32 = arith.constant 0 : i32
    %c0_i32_0 = arith.constant 0 : i32
    %c0_i32_1 = arith.constant 0 : i32
    return %arg0, %c0_i32, %c0_i32_0 : i32, i32, i32
  }
}

</mosaic_0001>

<bundles_post_ra>
// kernel: sub.1
= control target key start
LH: loop header
LB: loop body
LE: loop exit
PB: predicated region body
PF: predicated region fallthrough
CT: control target
= control target key end

     0   :  { %s56_s0 = inlined_call_operand.vmem [shape: f32[2,8,2], index: 0, kind: input, shape index: {}]   ;;  %s57_s1 = inlined_call_operand.vmem [shape: f32[2,8,2], index: 1, kind: input, shape index: {}]   ;;  %s58_s2 = inlined_call_operand.vmem [shape: f32[2,8,2], index: 2, kind: output, shape index: {}]  }
   0x1   :  { %v3_v0 = vld [vmem:[%s56_s0] sm:$0x3]  ;;  %v20_v2 = vld [vmem:[%s56_s0 + $0x2] sm:$0x3] }
   0x2   :  { %v4_v1 = vld [vmem:[%s57_s1] sm:$0x3]  ;;  %v21_v4 = vld [vmem:[%s57_s1 + $0x2] sm:$0x3] }
   0x3   :  { %v7_v3 = vsub.f32 %v3_v0, %v4_v1  ;;  %v16_v5 = vsub.f32 %v20_v2, %v21_v4 }
   0x5   :  { %9 = vst [vmem:[%s58_s2] sm:$0x3] %v7_v3 }
   0x6   :  { %22 = vst [vmem:[%s58_s2 + $0x2] sm:$0x3] %v16_v5 }

// kernel: mah_loss.1
= control target key start
LH: loop header
LB: loop body
LE: loop exit
PB: predicated region body
PF: predicated region fallthrough
CT: control target
= control target key end

     0   :  { %s276_s0 = inlined_call_operand.vmem [shape: f32[2,8,512], index: 0, kind: input, shape index: {}]   ;;  %s277_s1 = inlined_call_operand.vmem [shape: f32[4,8,512], index: 1, kind: input, shape index: {}]   ;;  %s278_s2 = inlined_call_operand.vmem [shape: f32[1,8,128], index: 2, kind: output, shape index: {}]  }
   0x1   :  { %v59_v0 = vld [vmem:[%s276_s0] sm:$0xff]  ;;  %v60_v1 = vld [vmem:[%s276_s0 + $0x8] sm:$0xff]  ;;  %v61_v2 = vld [vmem:[%s276_s0 + $0x10] sm:$0xff] }
   0x2   :  { %v62_v3 = vld [vmem:[%s276_s0 + $0x18] sm:$0xff]  ;;  %v168_v4 = vld [vmem:[%s276_s0 + $0x20] sm:$0xff]  ;;  %v169_v5 = vld [vmem:[%s276_s0 + $0x28] sm:$0xff] }
   0x3   :  { %v68_v6 = vld [vmem:[%s277_s1] sm:$0xff]  ;;  %v170_v7 = vld [vmem:[%s276_s0 + $0x30] sm:$0xff]  ;;  %v69_v8 = vld [vmem:[%s277_s1 + $0x8] sm:$0xff]  ;;  %v111_v18 = vmul.f32 %v168_v4, %v168_v4  ;;  %v112_v19 = vmul.f32 %v169_v5, %v169_v5 }
   0x4   :  { %v70_v9 = vld [vmem:[%s277_s1 + $0x10] sm:$0xff]  ;;  %v71_v10 = vld [vmem:[%s277_s1 + $0x18] sm:$0xff]  ;;  %v172_v11 = vld [vmem:[%s277_s1 + $0x20] sm:$0xff]  ;;  %v91_v17 = vmul.f32 %v68_v6, %v59_v0  ;;  %v92_v23 = vmul.f32 %v69_v8, %v60_v1  ;;  %v113_v26 = vmul.f32 %v170_v7, %v170_v7 }
   0x5   :  { %v173_v12 = vld [vmem:[%s277_s1 + $0x28] sm:$0xff]  ;;  %v174_v13 = vld [vmem:[%s277_s1 + $0x30] sm:$0xff]  ;;  %v175_v14 = vld [vmem:[%s277_s1 + $0x38] sm:$0xff]  ;;  %v93_v29 = vmul.f32 %v70_v9, %v61_v2  ;;  %v94_v30 = vmul.f32 %v71_v10, %v62_v3 }
   0x6   :  { %v176_v15 = vld [vmem:[%s277_s1 + $0x40] sm:$0xff]  ;;  %v177_v16 = vld [vmem:[%s277_s1 + $0x48] sm:$0xff]  ;;  %v171_v20 = vld [vmem:[%s276_s0 + $0x38] sm:$0xff] }
   0x7   :  { %v178_v21 = vld [vmem:[%s277_s1 + $0x50] sm:$0xff]  ;;  %v179_v22 = vld [vmem:[%s277_s1 + $0x58] sm:$0xff]  ;;  %v95_v24 = vadd.f32 %v176_v15, %v172_v11  ;;  %v96_v25 = vadd.f32 %v177_v16, %v173_v12  ;;  %v180_v27 = vld [vmem:[%s277_s1 + $0x60] sm:$0xff]  ;;  %v114_v36 = vmul.f32 %v171_v20, %v171_v20 }
   0x8   :  { %v181_v28 = vld [vmem:[%s277_s1 + $0x68] sm:$0xff]  ;;  %v97_v31 = vadd.f32 %v178_v21, %v174_v13  ;;  %v98_v32 = vadd.f32 %v179_v22, %v175_v14  ;;  %v182_v33 = vld [vmem:[%s277_s1 + $0x70] sm:$0xff]  ;;  %v183_v37 = vld [vmem:[%s277_s1 + $0x78] sm:$0xff]  ;;  %v115_v42 = vmul.f32 %v180_v27, %v111_v18 }
   0x9   :  { %v99_v34 = vmul.f32 %v168_v4, %v95_v24  ;;  %v100_v35 = vmul.f32 %v169_v5, %v96_v25  ;;  %v116_v43 = vmul.f32 %v181_v28, %v112_v19  ;;  %v117_v46 = vmul.f32 %v182_v33, %v113_v26 }
   0xa   :  { %v101_v38 = vmul.f32 %v170_v7, %v97_v31  ;;  %v102_v39 = vmul.f32 %v171_v20, %v98_v32  ;;  %v118_v49 = vmul.f32 %v183_v37, %v114_v36 }
   0xb   :  { %v103_v40 = vadd.f32 %v99_v34, %v91_v17  ;;  %v104_v41 = vadd.f32 %v100_v35, %v92_v23 }
   0xc   :  { %v105_v44 = vadd.f32 %v101_v38, %v93_v29  ;;  %v106_v45 = vadd.f32 %v102_v39, %v94_v30 }
   0xd   :  { %v107_v47 = vmul.f32 %v103_v40, %v59_v0  ;;  %v108_v48 = vmul.f32 %v104_v41, %v60_v1 }
   0xe   :  { %v109_v50 = vmul.f32 %v105_v44, %v61_v2  ;;  %v110_v51 = vmul.f32 %v106_v45, %v62_v3 }
   0xf   :  { %v119_v52 = vadd.f32 %v115_v42, %v107_v47  ;;  %v120_v53 = vadd.f32 %v116_v43, %v108_v48 }
  0x10   :  { %v121_v54 = vadd.f32 %v117_v46, %v109_v50  ;;  %v122_v55 = vadd.f32 %v118_v49, %v110_v51 }
  0x11   :  { %v138_v56 = vadd.f32 %v120_v53, %v119_v52 }
  0x13   :  { %v139_v57 = vadd.f32 %v138_v56, %v121_v54 }
  0x15   :  { %v140_v58 = vadd.f32 %v139_v57, %v122_v55 }
  0x17   :  { %141 = vadd.xlane.f32.xlu0 %v140_v58 }
  0x8a   :  { %v142_v59 = vpop.xlane.xlu0 %141 }
  0x8b   :  { %v143_v60 = vrot.slane %v142_v59, 4 }
  0x8d   :  { %v144_v61 = vadd.f32 %v143_v60, %v142_v59 }
  0x8f   :  { %v145_v62 = vrot.slane %v144_v61, 2 }
  0x91   :  { %v146_v63 = vadd.f32 %v145_v62, %v144_v61 }
  0x93   :  { %v147_v4 = vrot.slane %v146_v63, 1 }
  0x95   :  { %v148_v5 = vadd.f32 %v147_v4, %v146_v63 }
  0x97   :  { %184 = vpush %v148_v5 }
  0xc8   :  { %s185_s1 = spop %184 }
  0xc9   :  { %v150_v0 = vstv %s185_s1 }
  0xca   :  { %151 = vst [vmem:[%s278_s2] sm:$0xff] %v150_v0 }

</bundles_post_ra>
